<compile_context>
chip_gen: v6e
topology: v6e:2x2x1
jax: 0.10.0
libtpu: 0.0.40
codegen_flags: <defaults>
</compile_context>

<pallas_src>
import numpy as np
import jax
import jax.numpy as jnp
from jax import lax
from jax.experimental import pallas as pl
from jax.experimental.pallas import tpu as pltpu

NUM_OPS = 4   # number of candidate embedding ops in OPS
D = 32        # per-op embedding dim
E = NUM_OPS * D


def mixed_op_kernel(lens_ref, scale_ref, emb_ref, out_ref):
    """One grid step == one block of BB sentences.

    lens_ref  : VMEM (B, 1)     int32  -- full length table (resident, constant block)
    scale_ref : VMEM (1, E)     f32    -- softmax(weights) repeated D times (op-major)
    emb_ref   : VMEM (BB, T, E) f32    -- concatenated per-op token embeddings
    out_ref   : VMEM (BB, L, E)        -- padded output (CLS / tokens / SEP / zeros)
    """
    BB, T, e_dim = emb_ref.shape
    L = out_ref.shape[1]
    tail = L - T - 1

    # Per-sentence lengths for this block, sliced from the resident full table.
    start = pl.multiple_of(pl.program_id(0) * BB, BB)
    n = lens_ref[pl.ds(start, BB), :].reshape(BB, 1, 1)              # (BB,1,1) int32

    # Row 0: CLS = ones.
    out_ref[:, pl.ds(0, 1), :] = jnp.ones((BB, 1, e_dim), out_ref.dtype)

    # Rows 1..T: token t -> scaled embedding if t < n, SEP (2.0) if t == n, else 0.
    # Masks are (BB, T, 1) and lane-broadcast inside the selects.
    t_idx = lax.broadcasted_iota(jnp.int32, (BB, T, 1), 1)
    tok = jnp.where(t_idx < n,
                    emb_ref[...] * scale_ref[...],
                    jnp.where(t_idx == n, 2.0, 0.0))
    out_ref[:, pl.ds(1, T), :] = tok.astype(out_ref.dtype)

    # Rows T+1..L-1: SEP if row == n + 1 (only possible when n == T), else zero pad.
    r_idx = T + 1 + lax.broadcasted_iota(jnp.int32, (BB, tail, 1), 1)
    tail_vals = jnp.where(r_idx == n + 1, 2.0, 0.0)                  # (BB, tail, 1) f32
    out_ref[:, pl.ds(T + 1, tail), :] = jnp.broadcast_to(
        tail_vals, (BB, tail, e_dim)).astype(out_ref.dtype)


def _vmem_capacity_bytes():
    """Per-core VMEM capacity; conservative fallback if the query is unavailable."""
    try:
        cap = int(getattr(pltpu.get_tpu_info(), "vmem_capacity_bytes"))
        if cap > 0:
            return cap
    except Exception:
        pass
    return 64 << 20  # v7x per-core VMEM (smallest of the three generations)


def _per_sentence_vmem_bytes(T, L, e_dim, out_itemsize):
    """Real resident footprint per sentence in a block:
       2x double-buffered f32 input (T,E) + 2x double-buffered output (L,E)
       + ~one f32 (T,E) select temporary + ~one f32 (L,E)-ish tail/broadcast temp."""
    return e_dim * (2 * T * 4 + 2 * L * out_itemsize + (T + L) * 4)


def _pick_block_b(B, per_sentence_bytes, vmem_bytes):
    """Sentences per grid step: largest divisor of B that fits the VMEM budget,
    with >= 2 grid steps when B > 8 so v7x's two TensorCores both get work."""
    budget = max(4 << 20, int(vmem_bytes * 0.4))      # leave headroom vs. capacity
    cap = max(1, budget // max(per_sentence_bytes, 1))
    if B > 8:
        cap = min(cap, (B + 1) // 2)                  # at least 2 grid steps
    block_b = 1
    for div in range(1, min(B, cap) + 1):             # uniform blocks, no ragged tail
        if B % div == 0:
            block_b = div
    return block_b


def mixed_op_forward(per_op_embeddings, lengths, weights, *, seq_len=None,
                     block_b=None, out_dtype=jnp.float32):
    """per_op_embeddings: (B, T, NUM_OPS, D) float32 -- embedding of each op per token
       lengths:           (B,) ints (concrete)        -- true sentence lengths (<= T)
       weights:           (NUM_OPS,) float32          -- architecture logits
       seq_len:           optional padded length >= T + 2.  Default rounds T+2 up to a
                          multiple of 8 (dense stores); pass T+2 for the module-exact L.
       out_dtype:         jnp.float32 (module-exact) or jnp.bfloat16 (halves HBM bytes;
                          compute stays f32, cast only at the store).
    """
    per_op_embeddings = jnp.asarray(per_op_embeddings, jnp.float32)
    B, T, num_ops, d = per_op_embeddings.shape
    e_dim = num_ops * d

    lengths_np = np.asarray(lengths, dtype=np.int32).reshape(B)
    assert int(lengths_np.max()) <= T, "lengths cannot exceed the token axis"

    L = int(-((-(T + 2)) // 8) * 8) if seq_len is None else int(seq_len)
    assert L >= T + 2

    # Op-major concat is a free contiguous reshape; no zero-padded HBM copy here.
    emb_cat = per_op_embeddings.reshape(B, T, e_dim)

    # Hoisted out of the kernel: softmax over architecture logits and the per-lane
    # scale row (lanes [i*D, (i+1)*D) carry weight i, matching torch.cat order).
    w = jax.nn.softmax(jnp.asarray(weights, jnp.float32), axis=-1)        # (num_ops,)
    scale_row = jnp.repeat(w, d).reshape(1, e_dim)                         # (1, E)

    lens2d = jnp.asarray(lengths_np).reshape(B, 1)                         # (B, 1) int32

    out_itemsize = jnp.dtype(out_dtype).itemsize
    vmem_bytes = _vmem_capacity_bytes()
    per_sentence = _per_sentence_vmem_bytes(T, L, e_dim, out_itemsize)
    if block_b is None:
        block_b = _pick_block_b(B, per_sentence, vmem_bytes)
    assert B % block_b == 0, "block_b must divide B (uniform blocks, no ragged tail)"

    vmem_limit = int(min(vmem_bytes,
                         max(block_b * per_sentence + (8 << 20), 32 << 20)))

    grid = (B // block_b,)

    return pl.pallas_call(
        mixed_op_kernel,
        out_shape=jax.ShapeDtypeStruct((B, L, e_dim), out_dtype),
        grid=grid,
        in_specs=[
            pl.BlockSpec((B, 1), lambda b: (0, 0)),                 # full length table (resident)
            pl.BlockSpec((1, e_dim), lambda b: (0, 0)),             # scale row (resident)
            pl.BlockSpec((block_b, T, e_dim), lambda b: (b, 0, 0)),  # embeddings block
        ],
        out_specs=pl.BlockSpec((block_b, L, e_dim), lambda b: (b, 0, 0)),
        compiler_params=pltpu.CompilerParams(
            dimension_semantics=("parallel",),
            vmem_limit_bytes=vmem_limit),
    )(lens2d, scale_row, emb_cat)


def reference(per_op_embeddings, lengths, weights, L=None):
    """Pure numpy/JAX reference mirroring the PyTorch forward."""
    per_op = np.asarray(per_op_embeddings, np.float32)
    B, T, num_ops, d = per_op.shape
    e_dim = num_ops * d
    if L is None:
        L = int(np.asarray(lengths).max()) + 2
    w = np.asarray(jax.nn.softmax(jnp.asarray(weights, jnp.float32), axis=-1))
    out = np.zeros((B, L, e_dim), np.float32)
    for b in range(B):
        n = int(lengths[b])
        out[b, 0, :] = 1.0                                                 # CLS
        for t in range(n):
            out[b, t + 1, :] = np.concatenate(
                [per_op[b, t, i] * w[i] for i in range(num_ops)])
        out[b, n + 1, :] = 2.0                                             # SEP
    return out


if __name__ == "__main__":
    key = jax.random.PRNGKey(0)
    B, T = 2, 8
    k1, k2 = jax.random.split(key)
    per_op_emb = jax.random.normal(k1, (B, T, NUM_OPS, D), dtype=jnp.float32)
    arch_weights = jax.random.normal(k2, (NUM_OPS,), dtype=jnp.float32)
    lengths = np.array([8, 5], dtype=np.int32)            # true sentence lengths

    # Default path: 8-aligned padded length (dense stores); extra rows are zeros.
    out = jax.block_until_ready(mixed_op_forward(per_op_emb, lengths, arch_weights))
    np.testing.assert_allclose(
        np.asarray(out),
        reference(per_op_emb, lengths, arch_weights, L=out.shape[1]),
        rtol=1e-5, atol=1e-5)

    # Module-exact padded length: L = max(len) + 2.
    out_exact = jax.block_until_ready(
        mixed_op_forward(per_op_emb, lengths, arch_weights, seq_len=T + 2))
    np.testing.assert_allclose(
        np.asarray(out_exact),
        reference(per_op_emb, lengths, arch_weights),
        rtol=1e-5, atol=1e-5)

    # bfloat16 output path (halves HBM writeback; compute stays f32).
    out_bf16 = jax.block_until_ready(
        mixed_op_forward(per_op_emb, lengths, arch_weights, out_dtype=jnp.bfloat16))
    np.testing.assert_allclose(
        np.asarray(out_bf16.astype(jnp.float32)),
        reference(per_op_emb, lengths, arch_weights, L=out_bf16.shape[1]),
        rtol=2e-2, atol=2e-2)

    print("KERNEL_OK")
</pallas_src>

<mosaic_0001>
module attributes {stable_mosaic.version = 11 : i64} {
  func.func @mixed_op_kernel(%arg0: i32, %arg1: memref<2x1xi32, #tpu.memory_space<vmem>>, %arg2: memref<1x128xf32, #tpu.memory_space<vmem>>, %arg3: memref<2x8x128xf32, #tpu.memory_space<vmem>>, %arg4: memref<2x16x128xf32, #tpu.memory_space<vmem>>) attributes {dimension_semantics = [#tpu.dimension_semantics<parallel>], iteration_bounds = array<i64: 1>, scalar_prefetch = 0 : i64, scratch_operands = 0 : i64, tpu.core_type = #tpu.core_type<tc>, window_params = [{pipeline_mode = #tpu.pipeline_mode<synchronous>, transform_indices = @transform_0, window_bounds = array<i64: 2, 1>}, {pipeline_mode = #tpu.pipeline_mode<synchronous>, transform_indices = @transform_1, window_bounds = array<i64: 1, 128>}, {transform_indices = @transform_2, window_bounds = array<i64: 2, 8, 128>}, {transform_indices = @transform_3, window_bounds = array<i64: 2, 16, 128>}]} {
    %c2_i32 = arith.constant 2 : i32
    %0 = arith.muli %arg0, %c2_i32 : i32
    %1 = tpu.assume_multiple %0, 2 : i32
    %2 = arith.index_cast %1 : i32 to index
    %c0 = arith.constant 0 : index
    %3 = vector.load %arg1[%2, %c0] : memref<2x1xi32, #tpu.memory_space<vmem>>, vector<2x1xi32>
    %4 = vector.shape_cast %3 : vector<2x1xi32> to vector<2x1x1xi32>
    %cst = arith.constant 1.000000e+00 : f32
    %5 = vector.broadcast %cst : f32 to vector<2x1x128xf32>
    %c0_0 = arith.constant 0 : index
    %c0_1 = arith.constant 0 : index
    %c0_2 = arith.constant 0 : index
    %6 = vector.load %arg4[%c0_0, %c0_1, %c0_2] : memref<2x16x128xf32, #tpu.memory_space<vmem>>, vector<2x1x128xf32>
    tpu.vector_store %arg4[%c0_0, %c0_1, %c0_2], %5 {strides = array<i32>} : memref<2x16x128xf32, #tpu.memory_space<vmem>>, vector<2x1x128xf32>,
    %7 = tpu.iota {dimensions = array<i32: 1>} : vector<2x8x1xi32>
    %8 = vector.broadcast %4 : vector<2x1x1xi32> to vector<2x8x1xi32>
    %9 = arith.cmpi slt, %7, %8 : vector<2x8x1xi32>
    %c0_3 = arith.constant 0 : index
    %c0_4 = arith.constant 0 : index
    %c0_5 = arith.constant 0 : index
    %10 = vector.load %arg3[%c0_3, %c0_4, %c0_5] : memref<2x8x128xf32, #tpu.memory_space<vmem>>, vector<2x8x128xf32>
    %c0_6 = arith.constant 0 : index
    %c0_7 = arith.constant 0 : index
    %11 = vector.load %arg2[%c0_6, %c0_7] : memref<1x128xf32, #tpu.memory_space<vmem>>, vector<1x128xf32>
    %12 = vector.shape_cast %11 : vector<1x128xf32> to vector<1x1x128xf32>
    %13 = vector.broadcast %12 : vector<1x1x128xf32> to vector<2x8x128xf32>
    %14 = arith.mulf %10, %13 : vector<2x8x128xf32>
    %15 = vector.broadcast %4 : vector<2x1x1xi32> to vector<2x8x1xi32>
    %16 = arith.cmpi eq, %7, %15 : vector<2x8x1xi32>
    %cst_8 = arith.constant 2.000000e+00 : f32
    %cst_9 = arith.constant 0.000000e+00 : f32
    %17 = vector.broadcast %cst_8 : f32 to vector<2x8x1xf32>
    %18 = vector.broadcast %cst_9 : f32 to vector<2x8x1xf32>
    %19 = arith.select %16, %17, %18 : vector<2x8x1xi1>, vector<2x8x1xf32>
    %20 = vector.shape_cast %9 : vector<2x8x1xi1> to vector<2x8x1xi1>
    %21 = vector.broadcast %20 : vector<2x8x1xi1> to vector<2x8x128xi1>
    %22 = vector.shape_cast %19 : vector<2x8x1xf32> to vector<2x8x1xf32>
    %23 = vector.broadcast %22 : vector<2x8x1xf32> to vector<2x8x128xf32>
    %24 = arith.select %21, %14, %23 : vector<2x8x128xi1>, vector<2x8x128xf32>
    %c0_10 = arith.constant 0 : index
    %c1 = arith.constant 1 : index
    %c0_11 = arith.constant 0 : index
    %25 = vector.load %arg4[%c0_10, %c1, %c0_11] : memref<2x16x128xf32, #tpu.memory_space<vmem>>, vector<2x8x128xf32>
    tpu.vector_store %arg4[%c0_10, %c1, %c0_11], %24 {strides = array<i32>} : memref<2x16x128xf32, #tpu.memory_space<vmem>>, vector<2x8x128xf32>,
    %26 = tpu.iota {dimensions = array<i32: 1>} : vector<2x7x1xi32>
    %c9_i32 = arith.constant 9 : i32
    %27 = vector.broadcast %c9_i32 : i32 to vector<2x7x1xi32>
    %28 = arith.addi %27, %26 : vector<2x7x1xi32>
    %c1_i32 = arith.constant 1 : i32
    %29 = vector.broadcast %c1_i32 : i32 to vector<2x1x1xi32>
    %30 = arith.addi %4, %29 : vector<2x1x1xi32>
    %31 = vector.broadcast %30 : vector<2x1x1xi32> to vector<2x7x1xi32>
    %32 = arith.cmpi eq, %28, %31 : vector<2x7x1xi32>
    %cst_12 = arith.constant 2.000000e+00 : f32
    %cst_13 = arith.constant 0.000000e+00 : f32
    %33 = vector.broadcast %cst_12 : f32 to vector<2x7x1xf32>
    %34 = vector.broadcast %cst_13 : f32 to vector<2x7x1xf32>
    %35 = arith.select %32, %33, %34 : vector<2x7x1xi1>, vector<2x7x1xf32>
    %36 = vector.shape_cast %35 : vector<2x7x1xf32> to vector<2x7x1xf32>
    %37 = vector.broadcast %36 : vector<2x7x1xf32> to vector<2x7x128xf32>
    %c0_14 = arith.constant 0 : index
    %c9 = arith.constant 9 : index
    %c0_15 = arith.constant 0 : index
    %38 = vector.load %arg4[%c0_14, %c9, %c0_15] : memref<2x16x128xf32, #tpu.memory_space<vmem>>, vector<2x7x128xf32>
    tpu.vector_store %arg4[%c0_14, %c9, %c0_15], %37 {strides = array<i32>} : memref<2x16x128xf32, #tpu.memory_space<vmem>>, vector<2x7x128xf32>,
    return
  }
  func.func @transform_0(%arg0: i32) -> (i32, i32) {
    %c0_i32 = arith.constant 0 : i32
    %c0_i32_0 = arith.constant 0 : i32
    %c0_i32_1 = arith.constant 0 : i32
    return %c0_i32, %c0_i32_0 : i32, i32
  }
  func.func @transform_1(%arg0: i32) -> (i32, i32) {
    %c0_i32 = arith.constant 0 : i32
    %c0_i32_0 = arith.constant 0 : i32
    %c0_i32_1 = arith.constant 0 : i32
    return %c0_i32, %c0_i32_0 : i32, i32
  }
  func.func @transform_2(%arg0: i32) -> (i32, i32, i32) {
    %c0_i32 = arith.constant 0 : i32
    %c0_i32_0 = arith.constant 0 : i32
    %c0_i32_1 = arith.constant 0 : i32
    return %arg0, %c0_i32, %c0_i32_0 : i32, i32, i32
  }
  func.func @transform_3(%arg0: i32) -> (i32, i32, i32) {
    %c0_i32 = arith.constant 0 : i32
    %c0_i32_0 = arith.constant 0 : i32
    %c0_i32_1 = arith.constant 0 : i32
    return %arg0, %c0_i32, %c0_i32_0 : i32, i32, i32
  }
}

</mosaic_0001>

<bundles_post_ra>
// kernel: tpu_custom_call.1
= control target key start
LH: loop header
LB: loop body
LE: loop exit
PB: predicated region body
PF: predicated region fallthrough
CT: control target
= control target key end

     0   :  { %8 = vsyncpa [#allocation3], 0  ;;  %s263_s0 = inlined_call_operand.vmem [shape: s32[2,1], index: 0, kind: input, shape index: {}]   ;;  %s264_s1 = inlined_call_operand.vmem [shape: f32[1,128], index: 1, kind: input, shape index: {}]   ;;  %s265_s2 = inlined_call_operand.hbm [shape: f32[2,8,128], index: 2, kind: input, shape index: {}]   ;;  %s266_s3 = inlined_call_operand.hbm [shape: f32[2,16,128], index: 3, kind: output, shape index: {}]  }
   0x1   :  { %9 = vsyncpa [#allocation4], 0  ;;  %s217_s12 = smov [#allocation2]  }
   0x2   :  { %s19_s13 = sshll.u32 %s217_s12, 4  ;;  %s20_s13 = int_to_ptr.vmem [resolvable:$true] %s19_s13 }
   0x3   :  { %s181_s14 = scalar_lea.vmem %s20_s13, 256  ;;  %p186_p1 = scmp.lt.s32.totalorder %s20_s13, %s20_s13 }
   0x4   :  { %p182_p0 = scmp.ne.s32.totalorder %s20_s13, %s181_s14  ;;  %p187_p2 = scmp.lt.s32.totalorder %s181_s14, %s181_s14 }
   0x6   :  { %p188_p3 = por %p187_p2, %p186_p1 }
   0x8   :  { %p189_p4 = pnand %p188_p3, %p182_p0 }
   0xa   :  { %192 = shalt.err (!%p189_p4)
}
   0xb   :  { %s218_s15 = smov 128   ;;  %s219_s16 = smov 8  }
   0xc   :  { %25 = dma.hbm_to_vmem [thread:$0]  %s265_s2, 256, %s20_s13, [#allocation3], %s218_s15, %s218_s15, %s219_s16  }
   0xd   :  { %213 = dma.done.wait [#allocation3], 256  }
   0xe   :  { %214 = vsyncadd [#allocation3], 4294967040  ;;  %v43_v0 = vlaneseq  ;;  %v220_v1 = vmov 0   ;;  %v221_v2 = vmov 1966171168   ;;  %v222_v18 = vmov 0.0  }
   0xf   :  { %161 = vset.pattern.permute.xlu0 %v220_v1  ;;  %v41_v3 = vunpack.c.l.s4 %v221_v2  ;;  %162 = vset.pattern.permute.xlu1 %v220_v1  ;;  %v151_v8 = vld.sshfl [vmem:[%s263_s0] sm:$0x11 pattern:$0x75316420]  ;;  %v223_v28 = vmov 1.0   ;;  %v69_v32 = vld [vmem:[#allocation2 + $0x8] sm:$0xff] }
  0x10   :  { %v44_v4 = vshrl.u32 %v43_v0, 7  ;;  %v39_v10 = vcombine.high %v151_v8, %v151_v8  ;;  %54 = vst [vmem:[#allocation5] sm:$0x1] %v223_v28  ;;  %55 = vst [vmem:[#allocation5 + $0x10] sm:$0x1] %v223_v28  ;;  %v68_v30 = vld [vmem:[#allocation2] sm:$0xff] }
  0x11   :  { %v42_v5 = vunpack.c.0.s8 %v41_v3  ;;  %v152_v31 = vld [vmem:[%s264_s1] ss:$0 sm:$0xff]  ;;  %s224_s21 = smov [#allocation5]  }
  0x12   :  { %v60_v7 = vsub.s32 0, %v44_v4  ;;  %v107_v14 = vadd.s32 9, %v44_v4  ;;  %v77_v33 = vmul.f32 %v152_v31, %v68_v30  ;;  %v78_v34 = vmul.f32 %v152_v31, %v69_v32  ;;  %s139_s22 = sshll.u32 %s224_s21, 4  ;;  %s140_s22 = int_to_ptr.vmem [resolvable:$true] %s139_s22 }
  0x13   :  { %v45_v6 = vsub.s32 %v42_v5, %v44_v4  ;;  %s193_s1 = scalar_lea.vmem %s140_s22, 512  ;;  %p198_p6 = scmp.lt.s32.totalorder %s140_s22, %s140_s22 }
  0x14   :  { %p194_p5 = scmp.ne.s32.totalorder %s140_s22, %s193_s1  ;;  %p199_p7 = scmp.lt.s32.totalorder %s193_s1, %s193_s1 }
  0x15   :  { %v46_v9 = vrot.slane %v151_v8, %v45_v6  ;;  %v53_v13 = vrot.slane %v39_v10, %v45_v6 }
  0x16   :  { %p200_p8 = por %p199_p7, %p198_p6 }
  0x17   :  { %v61_v11 = vrot.slane %v46_v9, %v60_v7  ;;  %v108_v12 = vadd.s32 1, %v46_v9  ;;  %v65_v15 = vrot.slane %v53_v13, %v60_v7  ;;  %v109_v16 = vadd.s32 1, %v53_v13 }
  0x18   :  { %p201_p9 = pnand %p200_p8, %p194_p5 }
  0x19   :  { %vm66_vm0 = vcmp.lt.s32.totalorder %v44_v4, %v61_v11  ;;  %vm79_vm1 = vcmp.eq.s32.totalorder %v44_v4, %v61_v11  ;;  %v113_v20 = vrot.slane %v108_v12, %v60_v7  ;;  %vm80_vm2 = vcmp.eq.s32.totalorder %v44_v4, %v65_v15 }
  0x1a   :  { %v83_v17 = vsel %vm66_vm0, 1, %v220_v1  ;;  %v81_v19 = vsel %vm79_vm1, 2.0, %v222_v18  ;;  %vm67_vm3 = vcmp.lt.s32.totalorder %v44_v4, %v65_v15  ;;  %v117_v21 = vrot.slane %v109_v16, %v60_v7 }
  0x1b   :  { %86 = vperm.xlu0 %161, %v83_v17   ;;  %v82_v22 = vsel %vm80_vm2, 2.0, %v222_v18  ;;  %v84_v23 = vsel %vm67_vm3, 1, %v220_v1  ;;  %vm118_vm4 = vcmp.eq.s32.totalorder %v107_v14, %v113_v20 }
  0x1c   :  { %v163_v24 = vpack.i.bf16 %v82_v22, %v81_v19  ;;  %vm119_vm5 = vcmp.eq.s32.totalorder %v107_v14, %v117_v21  ;;  %v120_v25 = vsel %vm118_vm4, 2.0, %v222_v18 }
  0x1d   :  { %v121_v26 = vsel %vm119_vm5, 2.0, %v222_v18 }
  0x1e   :  { %164 = vperm.xlu1 %162, %v163_v24   ;;  %v168_v27 = vpack.i.bf16 %v121_v26, %v120_v25 }
  0x1f   :  { %89 = vperm.xlu0 %161, %v84_v23  }
  0x22   :  { %169 = vperm.xlu1 %162, %v168_v27  }
  0x96   :  { %v87_v29 = vpop.permute.xlu0 %86 }
  0x97   :  { %vm91_vm6 = vcmp.eq.s32.totalorder %v87_v29, 1 }
  0x99   :  { %v165_v35 = vpop.permute.xlu1 %164 }
  0x9a   :  { %v90_v36 = vpop.permute.xlu0 %89  ;;  %v167_v37 = vunpack.i.h.bf16 %v165_v35  ;;  %v166_v38 = vunpack.i.l.bf16 %v165_v35 }
  0x9b   :  { %vm92_vm7 = vcmp.eq.s32.totalorder %v90_v36, 1 }
  0x9c   :  { %v103_v39 = vsel %vm91_vm6, %v77_v33, %v166_v38  ;;  %v104_v40 = vsel %vm92_vm7, %v78_v34, %v167_v37 }
  0x9d   :  { %105 = vst [vmem:[#allocation5 + $0x1] sm:$0xff] %v103_v39  ;;  %106 = vst [vmem:[#allocation5 + $0x11] sm:$0xff] %v104_v40  ;;  %v170_v41 = vpop.permute.xlu1 %169 }
  0x9e   :  { %v172_v42 = vunpack.i.h.bf16 %v170_v41  ;;  %v171_v43 = vunpack.i.l.bf16 %v170_v41 }
  0xa0   :  { %133 = vst [vmem:[#allocation5 + $0x19] sm:$0x7f] %v172_v42  ;;  %132 = vst [vmem:[#allocation5 + $0x9] sm:$0x7f] %v171_v43 }
  0xa1   :  { %204 = shalt.err (!%p201_p9)
}
  0xa2   :  { %145 = dma.vmem_to_hbm [thread:$0]  %s140_s22, 512, %s266_s3, [#allocation4], %s218_s15, %s218_s15, %s219_s16  }
  0xa3   :  { %215 = dma.done.wait [#allocation4], 512  }
  0xa4   :  { %216 = vsyncadd [#allocation4], 4294966784 }
  0xa5   :  { %149 = vsyncpa [#allocation3], 1 }
  0xa6   :  { %150 = vsyncpa [#allocation4], 1 }

</bundles_post_ra>
